<compile_context>
chip_gen: v7x
topology: tpu7x:2x2x1
jax: 0.10.0
libtpu: 0.0.40
codegen_flags: <defaults>
</compile_context>

<pallas_src>
import functools

import jax
import jax.numpy as jnp
from jax.experimental import pallas as pl
from jax.experimental.pallas import tpu as pltpu

KSIZE = 7
PAD = KSIZE // 2


# --------------------------- pass 1: channel reduce ---------------------------

def _reduce_kernel(x_ref, feat_ref, mx_sc, sm_sc, *, inv_c):
    # x_ref:    (1, CC, TH, W)  one C-chunk of one (n, H-tile) block
    # feat_ref: (1, 2,  TH, W)  [max, mean] planes; written on the last C step
    # mx_sc/sm_sc: (TH, W) f32 running accumulators (persist across C steps)
    k = pl.program_id(2)

    @pl.when(k == 0)
    def _():
        mx_sc[...] = jnp.full_like(mx_sc, -jnp.inf)
        sm_sc[...] = jnp.zeros_like(sm_sc)

    mx = mx_sc[...]
    sm = sm_sc[...]
    cc = x_ref.shape[1]
    for c in range(cc):                        # fused: each plane read once
        xc = x_ref[0, c].astype(jnp.float32)   # TODO(synk): keep bf16 here on v6e/v7x
        mx = jnp.maximum(mx, xc)
        sm = sm + xc
    mx_sc[...] = mx
    sm_sc[...] = sm

    @pl.when(k == pl.num_programs(2) - 1)
    def _():
        feat_ref[0, 0] = mx
        feat_ref[0, 1] = sm * inv_c


# ---------------------- pass 2: 7x7 conv + bias + sigmoid ---------------------

def _conv_kernel(prev_ref, cur_ref, next_ref, w_ref, b_ref, o_ref):
    # prev/cur/next_ref: (1, 2, TH, W) reduced-feature blocks of H tiles
    #                    t-1 (clamped), t, t+1 (clamped)
    # w_ref: (98,) SMEM conv weights (OIHW flattened, O=1); b_ref: (1,) SMEM
    # o_ref: (1, 1, TH, W)
    _, _, TH, W = cur_ref.shape
    t = pl.program_id(1)
    n_t = pl.num_programs(1)

    # Hoisted column halo masks, shared by both channels and all 49 taps.
    col = jax.lax.broadcasted_iota(jnp.int32, (TH, W), 1)
    col_mask = {}
    for sx in range(-PAD, PAD + 1):
        if sx == 0:
            continue
        col_mask[sx] = (col < (W - sx)) if sx > 0 else (col >= -sx)

    # Interior tiles take real halo rows from neighbor tiles; only the first /
    # last tile zero them (image zero padding) -> no per-tap row masks.
    top_scale = (t > 0).astype(jnp.float32)
    bot_scale = (t < n_t - 1).astype(jnp.float32)

    acc = jnp.full((TH, W), b_ref[0], dtype=jnp.float32)
    for c in range(2):
        center = cur_ref[0, c].astype(jnp.float32)                         # (TH, W)
        top = prev_ref[0, c, TH - PAD:, :].astype(jnp.float32) * top_scale  # (3, W)
        bot = next_ref[0, c, :PAD, :].astype(jnp.float32) * bot_scale       # (3, W)
        padded = jnp.concatenate([top, center, bot], axis=0)               # (TH+6, W)
        base = c * KSIZE * KSIZE
        for dy in range(KSIZE):
            f = padded[dy:dy + TH, :]            # row tap: static slice, no mask
            inner = f * w_ref[base + dy * KSIZE + PAD]                      # sx == 0
            for dx in range(KSIZE):
                sx = dx - PAD
                if sx == 0:
                    continue
                g = pltpu.roll(f, shift=(-sx) % W, axis=1)   # lane shift (XLU)
                g = jnp.where(col_mask[sx], g, 0.0)
                inner = inner + g * w_ref[base + dy * KSIZE + dx]
            acc = acc + inner

    o_ref[0, 0] = jax.nn.sigmoid(acc).astype(o_ref.dtype)


# --------------------------------- wrappers ----------------------------------

def _pick_h_tile(h, cap=64):
    """Largest row tile that is a multiple of 8, divides H, and (when H allows)
    yields >= 2 tiles so both v7x TensorCores have work even at batch 1."""
    if h % 8 != 0:
        return h
    target = min(cap, max(8, h // 2))
    th = (target // 8) * 8
    while th >= 8:
        if h % th == 0:
            return th
        th -= 8
    return h


def _pick_c_chunk(c, cap=16):
    cc = min(c, cap)
    while c % cc:
        cc -= 1
    return cc


def spatial_attention(x, weight, bias):
    """x: (N, C, H, W); weight: (1, 2, 7, 7); bias: (1,). Returns (N, 1, H, W) f32."""
    N, C, H, W = x.shape
    TH = _pick_h_tile(H)
    T = H // TH
    CC = _pick_c_chunk(C)
    KC = C // CC

    w_flat = weight.reshape(-1).astype(jnp.float32)   # (98,)
    b_flat = bias.reshape(-1).astype(jnp.float32)     # (1,)

    # ---------------- pass 1: fused channel max + mean ----------------
    x_blk = CC * TH * W * x.dtype.itemsize
    feat_blk = 2 * TH * W * 4
    scratch_b = 2 * TH * W * 4
    vmem1 = int(2 * x_blk + 2 * feat_blk + scratch_b + (8 << 20))

    feat = pl.pallas_call(
        functools.partial(_reduce_kernel, inv_c=1.0 / C),
        out_shape=jax.ShapeDtypeStruct((N, 2, H, W), jnp.float32),
        grid=(N, T, KC),
        in_specs=[pl.BlockSpec((1, CC, TH, W), lambda n, t, k: (n, k, t, 0))],
        out_specs=pl.BlockSpec((1, 2, TH, W), lambda n, t, k: (n, 0, t, 0)),
        scratch_shapes=[pltpu.VMEM((TH, W), jnp.float32),
                        pltpu.VMEM((TH, W), jnp.float32)],
        compiler_params=pltpu.CompilerParams(
            dimension_semantics=("parallel", "parallel", "arbitrary"),
            vmem_limit_bytes=vmem1),
    )(x)

    # ------------- pass 2: 7x7 conv + sigmoid with row halos -------------
    out_blk = TH * W * 4
    vmem2 = int(3 * 2 * feat_blk + 2 * out_blk + (8 << 20))
    t_last = T - 1

    out = pl.pallas_call(
        _conv_kernel,
        out_shape=jax.ShapeDtypeStruct((N, 1, H, W), jnp.float32),
        grid=(N, T),
        in_specs=[
            pl.BlockSpec((1, 2, TH, W),
                         lambda n, t: (n, 0, jnp.maximum(t - 1, 0), 0)),
            pl.BlockSpec((1, 2, TH, W), lambda n, t: (n, 0, t, 0)),
            pl.BlockSpec((1, 2, TH, W),
                         lambda n, t: (n, 0, jnp.minimum(t + 1, t_last), 0)),
            pl.BlockSpec(memory_space=pltpu.MemorySpace.SMEM),
            pl.BlockSpec(memory_space=pltpu.MemorySpace.SMEM),
        ],
        out_specs=pl.BlockSpec((1, 1, TH, W), lambda n, t: (n, 0, t, 0)),
        compiler_params=pltpu.CompilerParams(
            dimension_semantics=("parallel", "parallel"),
            vmem_limit_bytes=vmem2),
    )(feat, feat, feat, w_flat, b_flat)
    return out


def spatial_attention_ref(x, weight, bias):
    """Pure-JAX reference matching the PyTorch forward exactly."""
    mx = jnp.max(x, axis=1, keepdims=True)
    av = jnp.mean(x, axis=1, keepdims=True)
    feat = jnp.concatenate([mx, av], axis=1)                      # (N, 2, H, W)
    out = jax.lax.conv_general_dilated(
        feat, weight, window_strides=(1, 1),
        padding=((PAD, PAD), (PAD, PAD)),
        dimension_numbers=("NCHW", "OIHW", "NCHW"))
    return jax.nn.sigmoid(out + bias.reshape(1, 1, 1, 1))


if __name__ == "__main__":
    key = jax.random.PRNGKey(0)
    kx, kw, kb = jax.random.split(key, 3)

    N, C, H, W = 2, 4, 16, 16
    x = jax.random.normal(kx, (N, C, H, W), dtype=jnp.float32)

    # Deterministic synthetic params (PyTorch nn.Conv2d(2, 1, 7, padding=3) shapes).
    weight = jax.random.normal(kw, (1, 2, KSIZE, KSIZE), dtype=jnp.float32) * 0.1
    bias = jax.random.normal(kb, (1,), dtype=jnp.float32) * 0.1

    out = spatial_attention(x, weight, bias)
    out = jax.block_until_ready(out)

    ref = spatial_attention_ref(x, weight, bias)
    assert out.shape == (N, 1, H, W), out.shape
    assert jnp.allclose(out, ref, atol=1e-5, rtol=1e-5), float(jnp.max(jnp.abs(out - ref)))

    print("KERNEL_OK")
</pallas_src>

<mosaic_0001>
module attributes {stable_mosaic.version = 11 : i64} {
  func.func @_reduce_kernel(%arg0: i32, %arg1: i32, %arg2: i32, %arg3: memref<1x4x8x16xf32, #tpu.memory_space<vmem>>, %arg4: memref<1x2x8x16xf32, #tpu.memory_space<vmem>>, %arg5: memref<8x16xf32, #tpu.memory_space<vmem>>, %arg6: memref<8x16xf32, #tpu.memory_space<vmem>>) attributes {dimension_semantics = [#tpu.dimension_semantics<parallel>, #tpu.dimension_semantics<parallel>, #tpu.dimension_semantics<arbitrary>], iteration_bounds = array<i64: 2, 2, 1>, scalar_prefetch = 0 : i64, scratch_operands = 2 : i64, tpu.core_type = #tpu.core_type<tc>, window_params = [{transform_indices = @transform_0, window_bounds = array<i64: 1, 4, 8, 16>}, {transform_indices = @transform_1, window_bounds = array<i64: 1, 2, 8, 16>}]} {
    %c0_i32 = arith.constant 0 : i32
    %0 = arith.cmpi eq, %arg2, %c0_i32 : i32
    %1 = arith.extui %0 : i1 to i32
    %c0_i32_0 = arith.constant 0 : i32
    %2 = arith.cmpi ne, %1, %c0_i32_0 : i32
    scf.if %2 {
      %cst = arith.constant 0xFF800000 : f32
      %26 = vector.broadcast %cst : f32 to vector<8x16xf32>
      %c0_23 = arith.constant 0 : index
      %c0_24 = arith.constant 0 : index
      %27 = vector.load %arg5[%c0_23, %c0_24] : memref<8x16xf32, #tpu.memory_space<vmem>>, vector<8x16xf32>
      tpu.vector_store %arg5[%c0_23, %c0_24], %26 {strides = array<i32>} : memref<8x16xf32, #tpu.memory_space<vmem>>, vector<8x16xf32>,
      %cst_25 = arith.constant 0.000000e+00 : f32
      %28 = vector.broadcast %cst_25 : f32 to vector<8x16xf32>
      %c0_26 = arith.constant 0 : index
      %c0_27 = arith.constant 0 : index
      %29 = vector.load %arg6[%c0_26, %c0_27] : memref<8x16xf32, #tpu.memory_space<vmem>>, vector<8x16xf32>
      tpu.vector_store %arg6[%c0_26, %c0_27], %28 {strides = array<i32>} : memref<8x16xf32, #tpu.memory_space<vmem>>, vector<8x16xf32>,
    } else {
    }
    %c0 = arith.constant 0 : index
    %c0_1 = arith.constant 0 : index
    %3 = vector.load %arg5[%c0, %c0_1] : memref<8x16xf32, #tpu.memory_space<vmem>>, vector<8x16xf32>
    %c0_2 = arith.constant 0 : index
    %c0_3 = arith.constant 0 : index
    %4 = vector.load %arg6[%c0_2, %c0_3] : memref<8x16xf32, #tpu.memory_space<vmem>>, vector<8x16xf32>
    %c0_4 = arith.constant 0 : index
    %c0_5 = arith.constant 0 : index
    %c0_6 = arith.constant 0 : index
    %c0_7 = arith.constant 0 : index
    %5 = vector.load %arg3[%c0_4, %c0_5, %c0_6, %c0_7] : memref<1x4x8x16xf32, #tpu.memory_space<vmem>>, vector<1x1x8x16xf32>
    %6 = vector.shape_cast %5 : vector<1x1x8x16xf32> to vector<8x16xf32>
    %7 = arith.maximumf %3, %6 : vector<8x16xf32>
    %8 = arith.addf %4, %6 : vector<8x16xf32>
    %c0_8 = arith.constant 0 : index
    %c1 = arith.constant 1 : index
    %c0_9 = arith.constant 0 : index
    %c0_10 = arith.constant 0 : index
    %9 = vector.load %arg3[%c0_8, %c1, %c0_9, %c0_10] : memref<1x4x8x16xf32, #tpu.memory_space<vmem>>, vector<1x1x8x16xf32>
    %10 = vector.shape_cast %9 : vector<1x1x8x16xf32> to vector<8x16xf32>
    %11 = arith.maximumf %7, %10 : vector<8x16xf32>
    %12 = arith.addf %8, %10 : vector<8x16xf32>
    %c0_11 = arith.constant 0 : index
    %c2 = arith.constant 2 : index
    %c0_12 = arith.constant 0 : index
    %c0_13 = arith.constant 0 : index
    %13 = vector.load %arg3[%c0_11, %c2, %c0_12, %c0_13] : memref<1x4x8x16xf32, #tpu.memory_space<vmem>>, vector<1x1x8x16xf32>
    %14 = vector.shape_cast %13 : vector<1x1x8x16xf32> to vector<8x16xf32>
    %15 = arith.maximumf %11, %14 : vector<8x16xf32>
    %16 = arith.addf %12, %14 : vector<8x16xf32>
    %c0_14 = arith.constant 0 : index
    %c3 = arith.constant 3 : index
    %c0_15 = arith.constant 0 : index
    %c0_16 = arith.constant 0 : index
    %17 = vector.load %arg3[%c0_14, %c3, %c0_15, %c0_16] : memref<1x4x8x16xf32, #tpu.memory_space<vmem>>, vector<1x1x8x16xf32>
    %18 = vector.shape_cast %17 : vector<1x1x8x16xf32> to vector<8x16xf32>
    %19 = arith.maximumf %15, %18 : vector<8x16xf32>
    %20 = arith.addf %16, %18 : vector<8x16xf32>
    %c0_17 = arith.constant 0 : index
    %c0_18 = arith.constant 0 : index
    %21 = vector.load %arg5[%c0_17, %c0_18] : memref<8x16xf32, #tpu.memory_space<vmem>>, vector<8x16xf32>
    tpu.vector_store %arg5[%c0_17, %c0_18], %19 {strides = array<i32>} : memref<8x16xf32, #tpu.memory_space<vmem>>, vector<8x16xf32>,
    %c0_19 = arith.constant 0 : index
    %c0_20 = arith.constant 0 : index
    %22 = vector.load %arg6[%c0_19, %c0_20] : memref<8x16xf32, #tpu.memory_space<vmem>>, vector<8x16xf32>
    tpu.vector_store %arg6[%c0_19, %c0_20], %20 {strides = array<i32>} : memref<8x16xf32, #tpu.memory_space<vmem>>, vector<8x16xf32>,
    %c0_i32_21 = arith.constant 0 : i32
    %23 = arith.cmpi eq, %arg2, %c0_i32_21 : i32
    %24 = arith.extui %23 : i1 to i32
    %c0_i32_22 = arith.constant 0 : i32
    %25 = arith.cmpi ne, %24, %c0_i32_22 : i32
    scf.if %25 {
      %c0_23 = arith.constant 0 : index
      %c0_24 = arith.constant 0 : index
      %c0_25 = arith.constant 0 : index
      %c0_26 = arith.constant 0 : index
      %26 = vector.load %arg4[%c0_23, %c0_24, %c0_25, %c0_26] : memref<1x2x8x16xf32, #tpu.memory_space<vmem>>, vector<1x1x8x16xf32>
      %27 = vector.shape_cast %26 : vector<1x1x8x16xf32> to vector<8x16xf32>
      %28 = vector.shape_cast %19 : vector<8x16xf32> to vector<1x1x8x16xf32>
      tpu.vector_store %arg4[%c0_23, %c0_24, %c0_25, %c0_26], %28 {strides = array<i32>} : memref<1x2x8x16xf32, #tpu.memory_space<vmem>>, vector<1x1x8x16xf32>,
      %cst = arith.constant 2.500000e-01 : f32
      %29 = vector.broadcast %cst : f32 to vector<8x16xf32>
      %30 = arith.mulf %20, %29 : vector<8x16xf32>
      %c0_27 = arith.constant 0 : index
      %c1_28 = arith.constant 1 : index
      %c0_29 = arith.constant 0 : index
      %c0_30 = arith.constant 0 : index
      %31 = vector.load %arg4[%c0_27, %c1_28, %c0_29, %c0_30] : memref<1x2x8x16xf32, #tpu.memory_space<vmem>>, vector<1x1x8x16xf32>
      %32 = vector.shape_cast %31 : vector<1x1x8x16xf32> to vector<8x16xf32>
      %33 = vector.shape_cast %30 : vector<8x16xf32> to vector<1x1x8x16xf32>
      tpu.vector_store %arg4[%c0_27, %c1_28, %c0_29, %c0_30], %33 {strides = array<i32>} : memref<1x2x8x16xf32, #tpu.memory_space<vmem>>, vector<1x1x8x16xf32>,
    } else {
    }
    return
  }
  func.func @transform_0(%arg0: i32, %arg1: i32, %arg2: i32) -> (i32, i32, i32, i32) {
    %c0_i32 = arith.constant 0 : i32
    %c0_i32_0 = arith.constant 0 : i32
    return %arg0, %arg2, %arg1, %c0_i32 : i32, i32, i32, i32
  }
  func.func @transform_1(%arg0: i32, %arg1: i32, %arg2: i32) -> (i32, i32, i32, i32) {
    %c0_i32 = arith.constant 0 : i32
    %c0_i32_0 = arith.constant 0 : i32
    %c0_i32_1 = arith.constant 0 : i32
    return %arg0, %c0_i32, %arg1, %c0_i32_0 : i32, i32, i32, i32
  }
}

</mosaic_0001>

<bundles_post_ra>
// kernel: tpu_custom_call.1
= control target key start
LH: loop header
LB: loop body
LE: loop exit
PB: predicated region body
PF: predicated region fallthrough
CT: control target
= control target key end

     0   :  { %6 = vsyncpa [#allocation5], 0  ;;  %s764_s0 = inlined_call_operand.hbm [shape: f32[2,4,16,16], index: 0, kind: input, shape index: {}]   ;;  %s765_s1 = inlined_call_operand.hbm [shape: f32[2,2,16,16], index: 1, kind: output, shape index: {}]  }
   0x1   :  { %8 = vsyncpa [#allocation5 + $0x1], 0 }
   0x2   :  { %9 = vsyncpa [#allocation6], 0 }
   0x3   :  { %11 = vsyncpa [#allocation6 + $0x1], 0  ;;  %s562_s6 = smov 0   ;;  %s564_s7 = smov 0  }
   0x4   :  { %s566_s8 = smov 0   ;;  %s568_s9 = smov 0  }
   0x5   :  { %s570_s10 = smov 0   ;;  %s572_s11 = smov 0  }
   0x6   :  { %s574_s12 = smov 0   ;;  %s576_s13 = smov 0  }
   0x7 LB: > { %s307_s14 = sadd.s32 4294967295, %s540_s13   ;;  %s308_s15 = sadd.s32 4294967294, %s540_s13   ;;  %s540_s13 = sphi %s576_s13, %s17_s13   ;;  %s536_s12 = sphi %s574_s12, %s780_s12   ;;  %s532_s11 = sphi %s572_s11, %s779_s11   ;;  %s528_s10 = sphi %s570_s10, %s778_s10   ;;  %s524_s9 = sphi %s568_s9, %s777_s9   ;;  %s520_s8 = sphi %s566_s8, %s776_s8   ;;  %s516_s7 = sphi %s564_s7, %s775_s7   ;;  %s512_s6 = sphi %s562_s6, %s774_s6  }
   0x8   : > { %s32_s16 = sadd.s32 1, %s532_s11  ;;  %s36_s17 = sadd.s32 1, %s536_s12 }
   0x9   : > { %p34_p0 = scmp.ge.s32.totalorder %s32_s16, 2  ;;  %s47_s18 = sadd.s32 1, %s520_s8 }
   0xa   : > { %p54_p1 = scmp.ne.s32.totalorder %s520_s8, %s516_s7  ;;  %p55_p2 = scmp.eq.s32.totalorder %s540_s13, 0 }
   0xb   : > { %s782_s16 = smov (%p34_p0, %s32_s16), 0  ;;  %s784_s17 = smov (!%p34_p0, %s36_s17), %s536_s12 }
   0xc   : > { %s43_s19 = ssub.s32 %s532_s11, %s782_s16  ;;  %p615_p3 = por %p55_p2, %p54_p1 }
   0xd   : > { %p38_p4 = scmp.ge.s32.totalorder %s784_s17, 2  ;;  %p60_p5 = scmp.ne.s32.totalorder %s516_s7, %s512_s6 }
   0xe   : > { %p61_p6 = scmp.eq.s32.totalorder %s307_s14, 0  ;;  %p86_p7 = scmp.eq.s32.totalorder %s307_s14, 3 }
   0xf   : > { %s786_s17 = smov (%p38_p4, %s784_s17), 0  ;;  %p92_p10 = scmp.eq.s32.totalorder %s308_s15, 3 }
  0x10   : > { %p623_p8 = por %p61_p6, %p60_p5  ;;  %p627_p9 = por %p86_p7, %p54_p1 }
  0x11   : > { %s40_s23 = ssub.s32 %s536_s12, %s786_s17  ;;  %p633_p12 = por %p92_p10, %p60_p5 }
  0x12   : > { %s769_s22 = scalar_select %p627_p9, 1, 0 }
  0x13   : > { %s44_s24 = sor.u32 %s43_s19, %s40_s23  ;;  %p338_p13 = scmp.lt.s32.totalorder %s540_s13, 4 }
  0x14   : > { %p45_p11 = scmp.eq.s32.totalorder %s44_s24, 0  ;;  %s112_s26 = sand.u32 1, %s520_s8  }
  0x15   : > { %s770_s25 = scalar_select %p633_p12, 1, 0 }
  0x16   : > { %s640_s27 = scalar_select %p45_p11, %s520_s8, %s47_s18  }
  0x17   : > { %s311_s28 = sshll.u32 %s112_s26, 5  ;;  %s312_s29 = sshll.u32 %s536_s12, 3 }
  0x18   : > { %s124_s30 = sadd.s32 %s532_s11, %s312_s29  ;;  %s116_s2 = scalar_lea.vmem [#allocation4], %s311_s28 }
  0x19   : > { %s127_s3 = sshll.u32 %s116_s2, 4  ;;  %s313_s4 = sshll.u32 %s124_s30, 7  ;;  %s644_s3 = int_to_ptr.vmem [resolvable:$true] %s127_s3 }
  0x1a   : > { %s649_s15 = scalar_lea.hbm %s764_s0, %s313_s4  ;;  %p653_p0 = pnand %p338_p13, %p615_p3 }
  0x1b   : > { %s657_s19 = scalar_lea.sflag [#allocation5], %s112_s26  ;;  %s412_s23 = scalar_lea.hbm %s649_s15, 512 }
  0x1c   : > { %p413_p1 = scmp.ne.s32.totalorder %s649_s15, %s412_s23  ;;  %p414_p2 = pneg %p653_p0 }
  0x1d   : > { %s417_s28 = scalar_lea.hbm %s764_s0, 2048  ;;  %p418_p3 = scmp.lt.u32.totalorder %s649_s15, %s764_s0 }
  0x1e   : > { %p415_p4 = pnand %p414_p2, %p413_p1  ;;  %p419_p6 = scmp.lt.u32.totalorder %s417_s28, %s412_s23 }
  0x1f   : > { %p421_p10 = scmp.lt.u32.totalorder %s412_s23, %s649_s15 }
  0x20   : > { %p416_p5 = pneg %p415_p4  ;;  %p420_p7 = por %p419_p6, %p418_p3 }
  0x22   : > { %p422_p11 = por %p421_p10, %p420_p7 }
  0x24   : > { %p423_p13 = pnand %p422_p11, %p416_p5 }
  0x26   : > { %426 = shalt.err (!%p423_p13)
}
  0x27   : > { %s427_s26 = scalar_lea.vmem %s644_s3, 512  ;;  %s542_s2 = smov [#allocation4]  }
  0x28   : > { %p428_p1 = scmp.ne.s32.totalorder %s644_s3, %s427_s26  ;;  %s432_s4 = sshll.u32 %s542_s2, 4  ;;  %s433_s4 = int_to_ptr.vmem [resolvable:$false] %s432_s4 }
  0x29   : > { %s434_s5 = scalar_lea.vmem %s433_s4, 1024  ;;  %p435_p9 = scmp.lt.s32.totalorder %s644_s3, %s433_s4 }
  0x2a   : > { %p430_p4 = pnand %p428_p1, %p414_p2  ;;  %p436_p3 = scmp.lt.s32.totalorder %s434_s5, %s427_s26 }
  0x2c   : > { %p431_p12 = pneg %p430_p4  ;;  %p437_p6 = por %p436_p3, %p435_p9 }
  0x2e   : > { %p438_p7 = pnand %p437_p6, %p431_p12 }
  0x30   : > { %441 = shalt.err (!%p438_p7)
}
  0x31   : > { %s543_s14 = smov 256   ;;  %s544_s23 = smov 128  }
  0x32   : > { %s545_s20 = smov 8   ;;  %p314_p2 = scmp.ge.s32.totalorder %s540_s13, 1 }
  0x33   : > { %333 = dma.hbm_to_vmem [thread:$0]  (!%p653_p0), %s649_s15, 512, %s644_s3, %s657_s19, %s543_s14, %s544_s23, %s545_s20  }
  0x34   : > { %p135_p5 = scmp.lt.s32.totalorder %s540_s13, 5 }
  0x36   : > { %p136_p10 = pnand %p314_p2, %p135_p5 }
  0x37   : > { %s688_s24 = sand.u32 (!%p136_p10), 1, %s516_s7  }
  0x38   : > { %139 = sbr.rel (%p136_p10) target bundleno = 99 (0x63), region = 24  ;;  %s315_s28 = sshll.u32 (!%p136_p10), %s688_s24, 5 }
  0x39   : > { %s142_s29 = scalar_lea.sflag (!%p136_p10), [#allocation5], %s688_s24  ;;  %s145_s30 = scalar_lea.vmem (!%p136_p10), [#allocation4], %s315_s28 }
  0x3f   : > { %503 = dma.done.wait (%p623_p8), %s142_s29, 512  }
  0x40   : > { %505 = vsyncadd (%p623_p8), %s142_s29, 4294966784  ;;  %vm169_vm0 = vcmask 130048   ;;  %v546_v0 = vmov 0.0   ;;  %v547_v1 = vmov -inf   ;;  %s316_s3 = sshll.u32 %s688_s24, 4  ;;  %v174_v2 = vld [vmem:[%s145_s30] sm:$0xff] }
  0x41   : > { %171 = vst.msk [vmem:[#allocation3] sm:$0xff] %vm169_vm0, %v546_v0  ;;  %170 = vst.msk [vmem:[#allocation2] sm:$0xff] %vm169_vm0, %v547_v1  ;;  %s322_s15 = sshll.u32 %s528_s10, 2  ;;  %v317_v4 = vld [vmem:[%s145_s30 + $0x8] sm:$0xff]  ;;  %v318_v8 = vld [vmem:[%s145_s30 + $0x10] sm:$0xff]  ;;  %s163_s18 = scalar_lea.vmem [#allocation7], %s316_s3 }
  0x42   : > { %s211_s21 = sadd.s32 %s524_s9, %s322_s15  ;;  %v319_v11 = vld [vmem:[%s145_s30 + $0x18] sm:$0xff]  ;;  %s214_s19 = sshll.u32 %s163_s18, 4  ;;  %s701_s19 = int_to_ptr.vmem [resolvable:$true] %s214_s19 }
  0x43   : > { %s323_s26 = sshll.u32 %s211_s21, 7  ;;  %s200_s4 = scalar_lea.sflag [#allocation6], %s688_s24 }
  0x44   : > { %s706_s9 = scalar_lea.hbm %s765_s1, %s323_s26  ;;  %s442_s5 = scalar_lea.vmem %s701_s19, 256 }
  0x45   : > { %p443_p8 = scmp.ne.s32.totalorder %s701_s19, %s442_s5  ;;  %p772_p9 = scmp.ne.s32.totalorder %s769_s22, 0 }
  0x46   : > { %s548_s14 = smov [#allocation7]  }
  0x47   : > { %p444_p12 = pnand %p443_p8, %p772_p9  ;;  %s446_s23 = sshll.u32 %s548_s14, 4  ;;  %s447_s23 = int_to_ptr.vmem [resolvable:$false] %s446_s23 }
  0x48   : > { %v173_v3 = vld [vmem:[#allocation3] sm:$0xff]  ;;  %v172_v5 = vld [vmem:[#allocation2] sm:$0xff]  ;;  %s448_s20 = scalar_lea.vmem %s447_s23, 512  ;;  %p449_p11 = scmp.lt.s32.totalorder %s701_s19, %s447_s23 }
  0x49   : > { %v176_v6 = vadd.f32 %v174_v2, %v173_v3  ;;  %v175_v7 = vmax.f32 %v172_v5, %v174_v2  ;;  %p445_p0 = pneg %p444_p12  ;;  %p450_p13 = scmp.lt.s32.totalorder %s448_s20, %s442_s5 }
  0x4b   : > { %v180_v9 = vadd.f32 %v317_v4, %v176_v6  ;;  %v179_v10 = vmax.f32 %v175_v7, %v317_v4  ;;  %p451_p1 = por %p450_p13, %p449_p11 }
  0x4d   : > { %v184_v12 = vadd.f32 %v318_v8, %v180_v9  ;;  %v183_v13 = vmax.f32 %v179_v10, %v318_v8  ;;  %p452_p4 = pnand %p451_p1, %p445_p0 }
  0x4f   : > { %v188_v14 = vadd.f32 %v319_v11, %v184_v12  ;;  %v187_v15 = vmax.f32 %v183_v13, %v319_v11 }
  0x51   : > { %191 = vst.msk [vmem:[#allocation3] sm:$0xff] %vm169_vm0, %v188_v14  ;;  %190 = vst.msk [vmem:[#allocation2] sm:$0xff] %vm169_vm0, %v187_v15  ;;  %v196_v16 = vmul.f32 0.25, %v188_v14 }
  0x52   : > { %195 = vst.msk [vmem:[%s163_s18] sm:$0xff] %vm169_vm0, %v187_v15 }
  0x53   : > { %320 = vst.msk [vmem:[%s163_s18 + $0x8] sm:$0xff] %vm169_vm0, %v196_v16 }
  0x54   : > { %455 = shalt.err (!%p452_p4)
}
  0x55   : > { %s456_s28 = scalar_lea.hbm %s706_s9, 256  ;;  %s460_s3 = scalar_lea.hbm %s765_s1, 1024 }
  0x56   : > { %p457_p3 = scmp.ne.s32.totalorder %s706_s9, %s456_s28  ;;  %p461_p2 = scmp.lt.u32.totalorder %s706_s9, %s765_s1 }
  0x57   : > { %p462_p5 = scmp.lt.u32.totalorder %s460_s3, %s456_s28  ;;  %p464_p8 = scmp.lt.u32.totalorder %s456_s28, %s706_s9 }
  0x58   : > { %p458_p6 = pnand %p457_p3, %p772_p9 }
  0x59   : > { %p463_p10 = por %p462_p5, %p461_p2 }
  0x5a   : > { %p459_p7 = pneg %p458_p6 }
  0x5b   : > { %p465_p12 = por %p464_p8, %p463_p10 }
  0x5d   : > { %p466_p0 = pnand %p465_p12, %p459_p7 }
  0x5f   : > { %469 = shalt.err (!%p466_p0)
}
  0x60   : > { %s549_s18 = smov 128   ;;  %s550_s26 = smov 256  }
  0x61   : > { %s551_s10 = smov 8  }
  0x62   : > { %328 = dma.vmem_to_hbm [thread:$0]  (%p772_p9), %s701_s19, 256, %s706_s9, %s200_s4, %s549_s18, %s550_s26, %s551_s10  }
  0x63 PF: > { %p339_p11 = scmp.ge.s32.totalorder %s540_s13, 2  ;;  %s229_s2 = sand.u32 1, %s512_s6  }
  0x64   : > { %p773_p13 = scmp.ne.s32.totalorder %s770_s25, 0  ;;  %s230_s5 = scalar_lea.sflag [#allocation6], %s229_s2 }
  0x66   : > { %p335_p1 = pnand %p339_p11, %p773_p13 }
  0x68   : > { %507 = dma.done.wait (!%p335_p1), %s230_s5, 256  }
  0x69   : > { %509 = vsyncadd (!%p335_p1), %s230_s5, 4294967040  ;;  %s17_s13 = sadd.s32 1, %s540_s13   ;;  %s774_s6 = smov %s516_s7 }
  0x6a   : > { %p14_p4 = scmp.ge.s32.totalorder %s17_s13, 6   ;;  %s775_s7 = smov %s520_s8 }
  0x6b   : > { %s776_s8 = smov %s640_s27  ;;  %s777_s9 = smov %s532_s11 }
  0x6c   : > { %s778_s10 = smov %s536_s12  ;;  %s779_s11 = smov %s782_s16 }
  0x6d   : > { %s780_s12 = smov %s786_s17  ;;  %16 = sbr.rel (!%p14_p4) target bundleno = 7 (0x7), region = 81 }
  0x74   :  { %235 = vsyncpa [#allocation5], 1 }
  0x75   :  { %237 = vsyncpa [#allocation5 + $0x1], 1 }
  0x76   :  { %238 = vsyncpa [#allocation6], 1 }
  0x77   :  { %240 = vsyncpa [#allocation6 + $0x1], 1 }

</bundles_post_ra>
